<compile_context>
chip_gen: v6e
topology: v6e:2x2x1
jax: 0.10.0
libtpu: 0.0.40
codegen_flags: <defaults>
</compile_context>

<pallas_src>
import functools

import numpy as np
import jax
import jax.numpy as jnp
from jax.experimental import pallas as pl
from jax.experimental.pallas import tpu as pltpu

NO_RELATION_ID = 0  # constant.LABEL_TO_ID['no_relation'] == 0 (TACRED convention)


def _round_up(x, m):
    return ((x + m - 1) // m) * m


def _effective_distance_matrix(dis_matrix, lca_matrix, use_lca):
    """E[g, p] == distance factor the PyTorch module returns for (pred=p, gold=g)."""
    dis = jnp.asarray(dis_matrix, jnp.float32)               # (C, C)
    c = dis.shape[0]
    dis_max = jnp.max(dis)                                    # DIS_MAX hoisted out of the kernel
    if use_lca:
        lca = jnp.asarray(lca_matrix, jnp.int32)
        base = jnp.take_along_axis(dis, lca, axis=1)          # DIS[g, LCA[g, p]] (exact int gather)
    else:
        base = dis                                            # DIS[g, p]
    g = jnp.arange(c, dtype=jnp.int32)[:, None]
    p = jnp.arange(c, dtype=jnp.int32)[None, :]
    gold_nr = g == NO_RELATION_ID
    pred_nr = p == NO_RELATION_ID
    return jnp.where(gold_nr & ~pred_nr, 2.0 * dis_max,
                     jnp.where(pred_nr & ~gold_nr, dis_max, base))


def _hier_loss_kernel(logits_ref, labels_ref, et_ref, loss_ref, dist_ref,
                      *, n_valid, tile_n):
    # Transposed layout: class axis on sublanes (C=16), batch axis lane-dense.
    logits = logits_ref[...].astype(jnp.float32)              # (C, TILE_N)
    labels = labels_ref[...]                                   # (1, TILE_N) int32
    e_t = et_ref[...]                                          # (C, C) f32, E^T (resident)

    c, tn = logits.shape
    cls = jax.lax.broadcasted_iota(jnp.int32, (c, tn), 0)      # class id per sublane

    # Lane-validity mask for the (implicitly padded) edge block.
    pos = pl.program_id(0) * tile_n + jax.lax.broadcasted_iota(jnp.int32, (1, tn), 1)
    valid = pos < n_valid                                      # (1, TILE_N) bool

    # ---- CrossEntropyLoss(reduction='none'): log-softmax + gold gather ------
    m = jnp.max(logits, axis=0, keepdims=True)                 # (1, TILE_N)
    z = logits - m
    lse = jnp.log(jnp.sum(jnp.exp(z), axis=0, keepdims=True))  # (1, TILE_N)
    logp = z - lse                                             # (C, TILE_N)
    gold_mask = cls == labels                                  # one-hot gold (bool)
    ce = -jnp.sum(jnp.where(gold_mask, logp, 0.0), axis=0, keepdims=True)   # (1, TILE_N)

    # ---- argmax(logits, class axis); first occurrence on ties (numpy rule) --
    # TODO(synk): torch.argmax tie order is not formally specified; exact
    # parity on perfectly tied logits is best-effort.
    is_max = logits == m
    pred = jnp.min(jnp.where(is_max, cls, c), axis=0, keepdims=True)        # (1, TILE_N)
    pred_mask = cls == pred                                    # one-hot pred (bool)

    # ---- distance_factor[n] = E[gold[n], pred[n]] ----------------------------
    # E^T @ onehot_gold (f32; exact since one-hots are 0/1) gives E[gold[n], :]
    # per lane; mask with the pred one-hot and sublane-reduce -> (1, TILE_N).
    row_sel = jnp.dot(e_t, gold_mask.astype(jnp.float32),
                      preferred_element_type=jnp.float32)      # (C, TILE_N)
    dist = jnp.sum(jnp.where(pred_mask, row_sel, 0.0), axis=0, keepdims=True)

    dist = jnp.where(valid, dist, 0.0)                         # mask padded lanes (no NaN*0)
    dist_ref[...] = dist                                       # (1, TILE_N) lane-dense store

    # ---- masked partial loss sum for this tile --------------------------------
    ce = jnp.where(valid, ce, 0.0)
    loss_ref[0] = jnp.sum(ce * dist, axis=1, keepdims=True)    # (1, 1) partial


def _choose_tile_n(n, tile_n):
    if tile_n is not None:
        tile_n = int(tile_n)
        if tile_n >= n:
            return n
        t = max(128, _round_up(tile_n, 128))        # lane-aligned blocks (or full extent)
        return n if t >= n else t
    if n <= 256:
        return n                                     # single full-extent block
    # >= 2 tiles (v7x dual TensorCore), multiples of 256, cap 2048 (v7x 64 MiB VMEM).
    return max(256, min(2048, _round_up((n + 1) // 2, 256)))


def hierarchical_distance_loss(logits, labels, dis_matrix, lca_matrix,
                               *, normalise=1.0, use_lca=False, tile_n=None):
    """Pallas implementation of HierarchicalDistanceLoss.forward.

    Returns (total_loss scalar float32, distance_factor (N,) float32).
    """
    n, c = logits.shape
    tile_n = _choose_tile_n(n, tile_n)
    num_tiles = (n + tile_n - 1) // tile_n
    n_pad = num_tiles * tile_n

    # Effective-distance table folded in the wrapper; transposed so the kernel's
    # gold gather is E^T @ onehot.  Kept f32 (exact for arbitrary distances).
    e_t = _effective_distance_matrix(dis_matrix, lca_matrix, use_lca).T      # (C, C)

    # Batch axis lane-dense: logits as (C, N), labels as a (1, N) row.
    # (Tiny layout copy -- logits is only N x C; the batch-dim jnp.pad is gone.)
    logits_t = jnp.swapaxes(logits, 0, 1)
    labels_row = labels.reshape(1, n).astype(jnp.int32)

    kernel = functools.partial(_hier_loss_kernel, n_valid=int(n), tile_n=int(tile_n))

    bytes_acc = (int(logits.size) * logits.dtype.itemsize
                 + 4 * n + 4 * c * c + 4 * n_pad + 4 * num_tiles)
    cost = pl.CostEstimate(flops=int(n_pad * c * (10 + 2 * c)),
                           transcendentals=int(n_pad * (c + 1)),
                           bytes_accessed=int(bytes_acc))

    loss_parts, dist_row = pl.pallas_call(
        kernel,
        grid=(num_tiles,),
        in_specs=[
            pl.BlockSpec((c, tile_n), lambda i: (0, i)),    # logits^T tile (pipelined)
            pl.BlockSpec((1, tile_n), lambda i: (0, i)),    # labels (lane-dense)
            pl.BlockSpec((c, c), lambda i: (0, 0)),         # E^T: resident across grid steps
        ],
        out_specs=(
            pl.BlockSpec((1, 1, 1), lambda i: (i, 0, 0)),   # per-tile loss partial
            pl.BlockSpec((1, tile_n), lambda i: (0, i)),    # lane-dense distance row
        ),
        out_shape=(jax.ShapeDtypeStruct((num_tiles, 1, 1), jnp.float32),
                   jax.ShapeDtypeStruct((1, n_pad), jnp.float32)),
        compiler_params=pltpu.CompilerParams(
            dimension_semantics=("parallel",),              # batch tiles across TCs (v7x)
            vmem_limit_bytes=32 * 1024 * 1024),
        cost_estimate=cost,
    )(logits_t, labels_row, e_t)

    total_loss = jnp.sum(loss_parts) / (n * float(normalise))
    distance_factor = dist_row[0, :n]
    return total_loss, distance_factor


def _reference(logits, labels, dis_matrix, lca_matrix, normalise, use_lca):
    """Pure-numpy reference reproducing the PyTorch forward semantics."""
    logits = np.asarray(logits, np.float32)
    labels = np.asarray(labels)
    dism = np.asarray(dis_matrix, np.float32)
    lcam = np.asarray(lca_matrix, np.int64)
    m = logits.max(-1, keepdims=True)
    z = logits - m
    logp = z - np.log(np.exp(z).sum(-1, keepdims=True))
    ce = -logp[np.arange(len(labels)), labels]
    pred = logits.argmax(-1)
    dmax = dism.max()
    df = []
    for p, g in zip(pred, labels):
        if g == NO_RELATION_ID and p != NO_RELATION_ID:
            df.append(dmax * 2)
        elif p == NO_RELATION_ID and g != NO_RELATION_ID:
            df.append(dmax)
        else:
            df.append(dism[g, lcam[g, p]] if use_lca else dism[g, p])
    df = np.asarray(df, np.float32)
    total = (ce * df).mean() / normalise
    return total, df


if __name__ == "__main__":
    key = jax.random.PRNGKey(0)

    C = 16  # 16 relation classes (class 0 = no_relation)
    # Deterministic synthetic hierarchy matrices (hierarchy.get_dis_lca_matrix()
    # is dataset-specific; shape-compatible integer-valued stand-ins).
    ii, jj = np.meshgrid(np.arange(C), np.arange(C), indexing="ij")
    DIS_MATRIX = ((np.abs(ii - jj) % 5) + (ii != jj).astype(np.int64)).astype(np.float32)
    LCA_MATRIX = np.minimum(ii, jj).astype(np.int32)
    normalise = 2.0

    ok = True
    # (N=20, single full-extent tile) and (N=300 with tile_n=128 -> 3 grid
    # steps, last one a partially-OOB edge block masked inside the kernel).
    for n, tile_n in ((20, None), (300, 128)):
        kln, klb = jax.random.split(jax.random.fold_in(key, n))
        logits = jax.random.normal(kln, (n, C), dtype=jnp.float32)
        labels = jax.random.randint(klb, (n,), 0, C, dtype=jnp.int32)

        for use_lca in (False, True):
            loss, dist = hierarchical_distance_loss(
                logits, labels, jnp.asarray(DIS_MATRIX), jnp.asarray(LCA_MATRIX),
                normalise=normalise, use_lca=use_lca, tile_n=tile_n)
            loss = jax.block_until_ready(loss)
            dist = jax.block_until_ready(dist)

            ref_loss, ref_dist = _reference(np.asarray(logits), np.asarray(labels),
                                            DIS_MATRIX, LCA_MATRIX, normalise, use_lca)
            ok &= np.allclose(np.asarray(loss), ref_loss, rtol=1e-4, atol=1e-5)
            ok &= np.allclose(np.asarray(dist), ref_dist, rtol=1e-4, atol=1e-5)

    if ok:
        print("KERNEL_OK")
</pallas_src>

<mosaic_0001>
module attributes {stable_mosaic.version = 11 : i64} {
  func.func @_hier_loss_kernel(%arg0: i32, %arg1: memref<16x20xf32, #tpu.memory_space<vmem>>, %arg2: memref<1x20xi32, #tpu.memory_space<vmem>>, %arg3: memref<16x16xf32, #tpu.memory_space<vmem>>, %arg4: memref<1x1x1xf32, #tpu.memory_space<vmem>>, %arg5: memref<1x20xf32, #tpu.memory_space<vmem>>) attributes {dimension_semantics = [#tpu.dimension_semantics<parallel>], iteration_bounds = array<i64: 1>, scalar_prefetch = 0 : i64, scratch_operands = 0 : i64, tpu.core_type = #tpu.core_type<tc>, window_params = [{transform_indices = @transform_0, window_bounds = array<i64: 16, 20>}, {transform_indices = @transform_1, window_bounds = array<i64: 1, 20>}, {pipeline_mode = #tpu.pipeline_mode<synchronous>, transform_indices = @transform_2, window_bounds = array<i64: 16, 16>}, {transform_indices = @transform_3, window_bounds = array<i64: 1, 1, 1>}, {transform_indices = @transform_4, window_bounds = array<i64: 1, 20>}]} {
    %c0 = arith.constant 0 : index
    %c0_0 = arith.constant 0 : index
    %0 = vector.load %arg1[%c0, %c0_0] : memref<16x20xf32, #tpu.memory_space<vmem>>, vector<16x20xf32>
    %c0_1 = arith.constant 0 : index
    %c0_2 = arith.constant 0 : index
    %1 = vector.load %arg2[%c0_1, %c0_2] : memref<1x20xi32, #tpu.memory_space<vmem>>, vector<1x20xi32>
    %c0_3 = arith.constant 0 : index
    %c0_4 = arith.constant 0 : index
    %2 = vector.load %arg3[%c0_3, %c0_4] : memref<16x16xf32, #tpu.memory_space<vmem>>, vector<16x16xf32>
    %3 = tpu.iota {dimensions = array<i32: 0>} : vector<16x20xi32>
    %c20_i32 = arith.constant 20 : i32
    %4 = arith.muli %arg0, %c20_i32 : i32
    %5 = tpu.iota {dimensions = array<i32: 1>} : vector<1x20xi32>
    %6 = vector.broadcast %4 : i32 to vector<1x20xi32>
    %7 = arith.addi %6, %5 : vector<1x20xi32>
    %c20_i32_5 = arith.constant 20 : i32
    %8 = vector.broadcast %c20_i32_5 : i32 to vector<1x20xi32>
    %9 = arith.cmpi slt, %7, %8 : vector<1x20xi32>
    %cst = arith.constant dense<0xFF800000> : vector<20xf32>
    %10 = vector.multi_reduction <maximumf>, %0, %cst [0] : vector<16x20xf32> to vector<20xf32>
    %11 = vector.shape_cast %10 : vector<20xf32> to vector<1x20xf32>
    %12 = vector.broadcast %11 : vector<1x20xf32> to vector<16x20xf32>
    %13 = arith.subf %0, %12 : vector<16x20xf32>
    %14 = math.exp %13 : vector<16x20xf32>
    %cst_6 = arith.constant dense<0.000000e+00> : vector<20xf32>
    %15 = vector.multi_reduction <add>, %14, %cst_6 [0] : vector<16x20xf32> to vector<20xf32>
    %16 = vector.shape_cast %15 : vector<20xf32> to vector<1x20xf32>
    %17 = math.log %16 : vector<1x20xf32>
    %18 = vector.broadcast %17 : vector<1x20xf32> to vector<16x20xf32>
    %19 = arith.subf %13, %18 : vector<16x20xf32>
    %20 = vector.broadcast %1 : vector<1x20xi32> to vector<16x20xi32>
    %21 = arith.cmpi eq, %3, %20 : vector<16x20xi32>
    %cst_7 = arith.constant 0.000000e+00 : f32
    %22 = vector.broadcast %cst_7 : f32 to vector<16x20xf32>
    %23 = arith.select %21, %19, %22 : vector<16x20xi1>, vector<16x20xf32>
    %cst_8 = arith.constant dense<0.000000e+00> : vector<20xf32>
    %24 = vector.multi_reduction <add>, %23, %cst_8 [0] : vector<16x20xf32> to vector<20xf32>
    %25 = vector.shape_cast %24 : vector<20xf32> to vector<1x20xf32>
    %cst_9 = arith.constant 0.000000e+00 : f32
    %26 = vector.broadcast %cst_9 : f32 to vector<1x20xf32>
    %27 = arith.subf %26, %25 : vector<1x20xf32>
    %28 = vector.broadcast %11 : vector<1x20xf32> to vector<16x20xf32>
    %29 = arith.cmpf oeq, %0, %28 : vector<16x20xf32>
    %c16_i32 = arith.constant 16 : i32
    %30 = vector.broadcast %c16_i32 : i32 to vector<16x20xi32>
    %31 = arith.select %29, %3, %30 : vector<16x20xi1>, vector<16x20xi32>
    %cst_10 = arith.constant dense<2147483647> : vector<20xi32>
    %32 = vector.multi_reduction <minsi>, %31, %cst_10 [0] : vector<16x20xi32> to vector<20xi32>
    %33 = vector.shape_cast %32 : vector<20xi32> to vector<1x20xi32>
    %34 = vector.broadcast %33 : vector<1x20xi32> to vector<16x20xi32>
    %35 = arith.cmpi eq, %3, %34 : vector<16x20xi32>
    %36 = arith.extui %21 : vector<16x20xi1> to vector<16x20xi32>
    %37 = arith.sitofp %36 : vector<16x20xi32> to vector<16x20xf32>
    %cst_11 = arith.constant dense<0.000000e+00> : vector<16x20xf32>
    %38 = tpu.matmul %2, %37, %cst_11 {dimension_numbers = #tpu.dot_dimension_numbers<[1], [0], [0], [1], [0, 0, 1, 1], [], []>} : vector<16x16xf32>, vector<16x20xf32>, vector<16x20xf32> -> vector<16x20xf32>
    %cst_12 = arith.constant 0.000000e+00 : f32
    %39 = vector.broadcast %cst_12 : f32 to vector<16x20xf32>
    %40 = arith.select %35, %38, %39 : vector<16x20xi1>, vector<16x20xf32>
    %cst_13 = arith.constant dense<0.000000e+00> : vector<20xf32>
    %41 = vector.multi_reduction <add>, %40, %cst_13 [0] : vector<16x20xf32> to vector<20xf32>
    %42 = vector.shape_cast %41 : vector<20xf32> to vector<1x20xf32>
    %cst_14 = arith.constant 0.000000e+00 : f32
    %43 = vector.broadcast %cst_14 : f32 to vector<1x20xf32>
    %44 = arith.select %9, %42, %43 : vector<1x20xi1>, vector<1x20xf32>
    %c0_15 = arith.constant 0 : index
    %c0_16 = arith.constant 0 : index
    %45 = vector.load %arg5[%c0_15, %c0_16] : memref<1x20xf32, #tpu.memory_space<vmem>>, vector<1x20xf32>
    tpu.vector_store %arg5[%c0_15, %c0_16], %44 {strides = array<i32>} : memref<1x20xf32, #tpu.memory_space<vmem>>, vector<1x20xf32>,
    %cst_17 = arith.constant 0.000000e+00 : f32
    %46 = vector.broadcast %cst_17 : f32 to vector<1x20xf32>
    %47 = arith.select %9, %27, %46 : vector<1x20xi1>, vector<1x20xf32>
    %48 = arith.mulf %47, %44 : vector<1x20xf32>
    %cst_18 = arith.constant dense<0.000000e+00> : vector<1xf32>
    %49 = vector.multi_reduction <add>, %48, %cst_18 [1] : vector<1x20xf32> to vector<1xf32>
    %50 = vector.shape_cast %49 : vector<1xf32> to vector<1x1xf32>
    %c0_19 = arith.constant 0 : index
    %c0_20 = arith.constant 0 : index
    %c0_21 = arith.constant 0 : index
    %51 = vector.load %arg4[%c0_19, %c0_20, %c0_21] : memref<1x1x1xf32, #tpu.memory_space<vmem>>, vector<1x1x1xf32>
    %52 = vector.shape_cast %51 : vector<1x1x1xf32> to vector<1x1xf32>
    %53 = vector.shape_cast %50 : vector<1x1xf32> to vector<1x1x1xf32>
    tpu.vector_store %arg4[%c0_19, %c0_20, %c0_21], %53 {strides = array<i32>} : memref<1x1x1xf32, #tpu.memory_space<vmem>>, vector<1x1x1xf32>,
    return
  }
  func.func @transform_0(%arg0: i32) -> (i32, i32) {
    %c0_i32 = arith.constant 0 : i32
    %c0_i32_0 = arith.constant 0 : i32
    return %c0_i32, %arg0 : i32, i32
  }
  func.func @transform_1(%arg0: i32) -> (i32, i32) {
    %c0_i32 = arith.constant 0 : i32
    %c0_i32_0 = arith.constant 0 : i32
    return %c0_i32, %arg0 : i32, i32
  }
  func.func @transform_2(%arg0: i32) -> (i32, i32) {
    %c0_i32 = arith.constant 0 : i32
    %c0_i32_0 = arith.constant 0 : i32
    %c0_i32_1 = arith.constant 0 : i32
    return %c0_i32, %c0_i32_0 : i32, i32
  }
  func.func @transform_3(%arg0: i32) -> (i32, i32, i32) {
    %c0_i32 = arith.constant 0 : i32
    %c0_i32_0 = arith.constant 0 : i32
    %c0_i32_1 = arith.constant 0 : i32
    return %arg0, %c0_i32, %c0_i32_0 : i32, i32, i32
  }
  func.func @transform_4(%arg0: i32) -> (i32, i32) {
    %c0_i32 = arith.constant 0 : i32
    %c0_i32_0 = arith.constant 0 : i32
    return %c0_i32, %arg0 : i32, i32
  }
}

</mosaic_0001>

<bundles_post_ra>
// kernel: tpu_custom_call.1
= control target key start
LH: loop header
LB: loop body
LE: loop exit
PB: predicated region body
PF: predicated region fallthrough
CT: control target
= control target key end

     0   :  { %10 = vsyncpa [#allocation3], 0  ;;  %s465_s0 = inlined_call_operand.hbm [shape: f32[16,20], index: 0, kind: input, shape index: {}]   ;;  %s466_s1 = inlined_call_operand.vmem [shape: s32[1,20], index: 1, kind: input, shape index: {}]   ;;  %s467_s2 = inlined_call_operand.hbm [shape: f32[16,16], index: 2, kind: input, shape index: {}]   ;;  %s468_s3 = inlined_call_operand.hbm [shape: f32[1,1,1], index: 3, kind: output, shape index: {0}]   ;;  %s469_s4 = inlined_call_operand.hbm [shape: f32[1,20], index: 4, kind: output, shape index: {1}]  }
   0x1   :  { %11 = vsyncpa [#allocation6], 0 }
   0x2   :  { %12 = vsyncpa [#allocation4], 0 }
   0x3   :  { %13 = vsyncpa [#allocation9], 0  ;;  %s382_s15 = smov [#allocation2]  }
   0x4   :  { %s19_s16 = sshll.u32 %s382_s15, 4  ;;  %s20_s16 = int_to_ptr.vmem [resolvable:$true] %s19_s16 }
   0x5   :  { %s302_s17 = scalar_lea.vmem %s20_s16, 256  ;;  %p307_p1 = scmp.lt.s32.totalorder %s20_s16, %s20_s16 }
   0x6   :  { %p303_p0 = scmp.ne.s32.totalorder %s20_s16, %s302_s17  ;;  %p308_p2 = scmp.lt.s32.totalorder %s302_s17, %s302_s17 }
   0x8   :  { %p309_p3 = por %p308_p2, %p307_p1 }
   0xa   :  { %p310_p4 = pnand %p309_p3, %p303_p0 }
   0xc   :  { %313 = shalt.err (!%p310_p4)
}
   0xd   :  { %s383_s18 = smov 128   ;;  %s384_s19 = smov 8  }
   0xe   :  { %25 = dma.hbm_to_vmem [thread:$0]  %s465_s0, 256, %s20_s16, [#allocation3], %s383_s18, %s383_s18, %s384_s19  }
   0xf   :  { %s385_s22 = smov [#allocation5]  }
  0x10   :  { %s33_s23 = sshll.u32 %s385_s22, 4  ;;  %s34_s23 = int_to_ptr.vmem [resolvable:$true] %s33_s23 }
  0x11   :  { %s322_s24 = scalar_lea.vmem %s34_s23, 256  ;;  %p327_p6 = scmp.lt.s32.totalorder %s34_s23, %s34_s23 }
  0x12   :  { %p323_p5 = scmp.ne.s32.totalorder %s34_s23, %s322_s24  ;;  %p328_p7 = scmp.lt.s32.totalorder %s322_s24, %s322_s24 }
  0x14   :  { %p329_p8 = por %p328_p7, %p327_p6 }
  0x16   :  { %p330_p9 = pnand %p329_p8, %p323_p5 }
  0x18   :  { %333 = shalt.err (!%p330_p9)
}
  0x19   :  { %39 = dma.hbm_to_vmem [thread:$0]  %s467_s2, 256, %s34_s23, [#allocation6], %s383_s18, %s383_s18, %s384_s19  }
  0x1a   :  { %374 = dma.done.wait [#allocation3], 256  }
  0x1b   :  { %375 = vsyncadd [#allocation3], 4294967040 }
  0x1c   :  { %376 = dma.done.wait [#allocation6], 256  }
  0x1d   :  { %377 = vsyncadd [#allocation6], 4294967040  ;;  %v51_v0 = vlaneseq  ;;  %vm130_vm0 = vcmask 130048   ;;  %v263_v3 = vld [vmem:[%s466_s1] ss:$0 sm:$0xff]  ;;  %v49_v4 = vld [vmem:[#allocation5] sm:$0xff] }
  0x1e   :  { %v386_v5 = vmov 1.0   ;;  %278 = vmatprep.mubr.msk.f32.mxu0 %vm130_vm0, %v49_v4  ;;  %v50_v6 = vld [vmem:[#allocation5 + $0x8] sm:$0xff]  ;;  %v46_v7 = vld [vmem:[#allocation2] sm:$0xff]  ;;  %v47_v8 = vld [vmem:[#allocation2 + $0x8] sm:$0xff]  ;;  %vm60_vm3 = vcmask 162816   ;;  %vm224_vm13 = vcmask 155648  }
  0x1f   :  { %v421_v1 = vshrl.u32 %v51_v0, 7  ;;  %v61_v9 = vsel %vm60_vm3, %v46_v7, -inf  ;;  %v62_v10 = vsel %vm60_vm3, %v47_v8, -inf  ;;  %s387_s1 = smov [#allocation8]  }
  0x20   :  { %v63_v11 = vmax.f32 %v61_v9, %v62_v10  ;;  %s249_s2 = sshll.u32 %s387_s1, 4  ;;  %s250_s2 = int_to_ptr.vmem [resolvable:$true] %s249_s2 }
  0x21   :  { %v424_v2 = vadd.s32 8, %v421_v1  ;;  %vm93_vm2 = vcmp.eq.s32.totalorder %v421_v1, %v263_v3  ;;  %s334_s28 = scalar_lea.vmem %s250_s2, 16  ;;  %s338_s29 = scalar_lea.vmem %s250_s2, 32 }
  0x22   :  { %v64_v12 = vrot.slane %v63_v11, 4  ;;  %p335_p10 = scmp.ne.s32.totalorder %s250_s2, %s334_s28  ;;  %p339_p11 = scmp.lt.s32.totalorder %s250_s2, %s250_s2 }
  0x23   :  { %vm94_vm1 = vcmp.eq.s32.totalorder %v424_v2, %v263_v3  ;;  %p340_p12 = scmp.lt.s32.totalorder %s338_s29, %s334_s28 }
  0x24   :  { %274 = vmatprep.subr.msk.mxu0 %vm94_vm1, %v386_v5  ;;  %v65_v13 = vmax.f32 %v63_v11, %v64_v12 }
  0x25   :  { %275 = vmatpush3.msk.msra.mxu0 %vm94_vm1, %v386_v5  ;;  %p341_p13 = por %p340_p12, %p339_p11 }
  0x26   :  { %276 = vmatprep.subr.msk.mxu0 %vm93_vm2, %v386_v5  ;;  %v66_v14 = vrot.slane %v65_v13, 2 }
  0x27   :  { %277 = vmatpush3.msk.msra.mxu0 %vm93_vm2, %v386_v5  ;;  %p342_p0 = pnand %p341_p13, %p335_p10 }
  0x28   :  { %279 = vmatmul.mubr.msk.f32.vlgmr.msra.gmra.mxu0 %vm130_vm0, %v50_v6  ;;  %v67_v15 = vmax.f32 %v65_v13, %v66_v14 }
  0x2a   :  { %v68_v16 = vrot.slane %v67_v15, 1 }
  0x2c   :  { %v69_v17 = vmax.f32 %v67_v15, %v68_v16 }
  0x2e   :  { %v70_v18 = vsub.f32 %v46_v7, %v69_v17  ;;  %v71_v19 = vsub.f32 %v47_v8, %v69_v17  ;;  %vm108_vm4 = vcmp.eq.f32.partialorder %v47_v8, %v69_v17  ;;  %vm107_vm5 = vcmp.eq.f32.partialorder %v46_v7, %v69_v17 }
  0x2f   :  { %v110_v33 = vsel %vm108_vm4, %v424_v2, 16  ;;  %v109_v34 = vsel %vm107_vm5, %v421_v1, 16  ;;  %v56_v7 = vand.u32 127, %v51_v0 }
  0x30   :  { %v72_v20 = vmul.f32 1.442695, %v70_v18  ;;  %v74_v21 = vmul.f32 1.442695, %v71_v19  ;;  %v111_v35 = vsel %vm60_vm3, %v109_v34, 2147483647 }
  0x31   :  { %v112_v36 = vsel %vm60_vm3, %v110_v33, 2147483647  ;;  %vm59_vm12 = vcmp.lt.s32.totalorder %v56_v7, 20 }
  0x32   :  { %288 = vpow2.f32 %v72_v20  ;;  %vm113_vm6 = vcmp.lt.s32.totalorder %v111_v35, %v112_v36 }
  0x33   :  { %290 = vpow2.f32 %v74_v21  ;;  %v114_v37 = vsel %vm113_vm6, %v111_v35, %v112_v36 }
  0x34   :  { %v115_v39 = vrot.slane %v114_v37, 4 }
  0x36   :  { %vm116_vm7 = vcmp.lt.s32.totalorder %v114_v37, %v115_v39 }
  0x37   :  { %v117_v43 = vsel %vm116_vm7, %v114_v37, %v115_v39 }
  0x38   :  { %v118_v44 = vrot.slane %v117_v43, 2 }
  0x3a   :  { %vm119_vm8 = vcmp.lt.s32.totalorder %v117_v43, %v118_v44 }
  0x3b   :  { %v120_v50 = vsel %vm119_vm8, %v117_v43, %v118_v44 }
  0x3c   :  { %v121_v51 = vrot.slane %v120_v50, 1 }
  0x3e   :  { %vm122_vm9 = vcmp.lt.s32.totalorder %v120_v50, %v121_v51 }
  0x3f   :  { %v289_v22 = vpop.eup %288  ;;  %v123_v54 = vsel %vm122_vm9, %v120_v50, %v121_v51 }
  0x40   :  { %v291_v23 = vpop.eup %290  ;;  %v76_v24 = vsel %vm60_vm3, %v289_v22, 0.0  ;;  %vm125_vm10 = vcmp.eq.s32.totalorder %v424_v2, %v123_v54  ;;  %vm124_vm11 = vcmp.eq.s32.totalorder %v421_v1, %v123_v54 }
  0x41   :  { %v77_v25 = vsel %vm60_vm3, %v291_v23, 0.0 }
  0x42   :  { %v78_v26 = vadd.f32 %v77_v25, %v76_v24 }
  0x44   :  { %v79_v27 = vrot.slane %v78_v26, 4 }
  0x46   :  { %v80_v28 = vadd.f32 %v79_v27, %v78_v26 }
  0x48   :  { %v81_v29 = vrot.slane %v80_v28, 2 }
  0x4a   :  { %v82_v30 = vadd.f32 %v81_v29, %v80_v28 }
  0x4c   :  { %v83_v31 = vrot.slane %v82_v30, 1 }
  0x4e   :  { %v84_v32 = vadd.f32 %v83_v31, %v82_v30 }
  0x50   :  { %292 = vlog2.f32 %v84_v32 }
  0x5d   :  { %v293_v38 = vpop.eup %292 }
  0x5e   :  { %v86_v40 = vmul.f32 0.6931472, %v293_v38 }
  0x60   :  { %v88_v41 = vsub.f32 %v71_v19, %v86_v40  ;;  %v87_v42 = vsub.f32 %v70_v18, %v86_v40 }
  0x62   :  { %v96_v45 = vsel %vm94_vm1, %v88_v41, 0.0  ;;  %v95_v46 = vsel %vm93_vm2, %v87_v42, 0.0 }
  0x63   :  { %v98_v47 = vsel %vm60_vm3, %v96_v45, 0.0  ;;  %v97_v48 = vsel %vm60_vm3, %v95_v46, 0.0 }
  0x64   :  { %v99_v49 = vadd.f32 %v98_v47, %v97_v48 }
  0x66   :  { %v100_v52 = vrot.slane %v99_v49, 4 }
  0x68   :  { %v101_v53 = vadd.f32 %v100_v52, %v99_v49 }
  0x6a   :  { %v102_v55 = vrot.slane %v101_v53, 2 }
  0x6c   :  { %v103_v58 = vadd.f32 %v102_v55, %v101_v53 }
  0x6e   :  { %v104_v3 = vrot.slane %v103_v58, 1 }
  0x70   :  { %v105_v6 = vadd.f32 %v104_v3, %v103_v58 }
  0x72   :  { %v106_v9 = vsub.f32 0.0, %v105_v6 }
  0x74   :  { %v226_v11 = vsel %vm59_vm12, %v106_v9, 0.0 }
  0xe8   :  { %v280_v56 = vpop.f32.mrf.mxu0 }
  0xe9   :  { %v213_v57 = vsel %vm125_vm10, %v280_v56, 0.0 }
  0xea   :  { %v203_v59 = vpop.f32.mrf.mxu0  ;;  %v215_v61 = vsel %vm60_vm3, %v213_v57, 0.0 }
  0xeb   :  { %v212_v60 = vsel %vm124_vm11, %v203_v59, 0.0 }
  0xec   :  { %v214_v62 = vsel %vm60_vm3, %v212_v60, 0.0 }
  0xed   :  { %v216_v63 = vadd.f32 %v215_v61, %v214_v62 }
  0xef   :  { %v217_v4 = vrot.slane %v216_v63, 4 }
  0xf1   :  { %v218_v5 = vadd.f32 %v217_v4, %v216_v63 }
  0xf3   :  { %v219_v8 = vrot.slane %v218_v5, 2 }
  0xf5   :  { %v220_v2 = vadd.f32 %v219_v8, %v218_v5 }
  0xf7   :  { %v221_v1 = vrot.slane %v220_v2, 1 }
  0xf9   :  { %v222_v10 = vadd.f32 %v221_v1, %v220_v2 }
  0xfb   :  { %v223_v12 = vsel %vm59_vm12, %v222_v10, 0.0 }
  0xfc   :  { %v227_v13 = vmul.f32 %v226_v11, %v223_v12  ;;  %225 = vst.msk [vmem:[#allocation8] sm:$0x1] %vm224_vm13, %v223_v12 }
  0xfe   :  { %v228_v14 = vsel %vm60_vm3, %v227_v13, 0.0 }
  0xff   :  { %229 = vadd.xlane.f32.xlu0 %v228_v14 }
 0x100   :  { %345 = shalt.err (!%p342_p0)
}
 0x101   :  { %252 = dma.vmem_to_hbm [thread:$0]  %s250_s2, 16, %s469_s4, [#allocation9]   ;;  %vm231_vm14 = vcmask 0  }
 0x102   :  { %s388_s6 = smov [#allocation7]  }
 0x103   :  { %s239_s7 = sshll.u32 %s388_s6, 4  ;;  %s240_s7 = int_to_ptr.vmem [resolvable:$true] %s239_s7 }
 0x104   :  { %s354_s8 = scalar_lea.vmem %s240_s7, 16  ;;  %s358_s9 = scalar_lea.vmem %s240_s7, 32 }
 0x105   :  { %p355_p1 = scmp.ne.s32.totalorder %s240_s7, %s354_s8  ;;  %p359_p2 = scmp.lt.s32.totalorder %s240_s7, %s240_s7 }
 0x106   :  { %p360_p3 = scmp.lt.s32.totalorder %s358_s9, %s354_s8 }
 0x108   :  { %p361_p4 = por %p360_p3, %p359_p2 }
 0x10a   :  { %p362_p5 = pnand %p361_p4, %p355_p1 }
 0x188   :  { %v230_v0 = vpop.xlane.xlu0 %229 }
 0x189   :  { %232 = vst.msk [vmem:[#allocation7] sm:$0x1] %vm231_vm14, %v230_v0 }
 0x18a   :  { %365 = shalt.err (!%p362_p5)
}
 0x18b   :  { %242 = dma.vmem_to_hbm [thread:$0]  %s240_s7, 16, %s468_s3, [#allocation4]  }
 0x18c   :  { %378 = dma.done.wait [#allocation4], 16  }
 0x18d   :  { %379 = vsyncadd [#allocation4], 4294967280 }
 0x18e   :  { %380 = dma.done.wait [#allocation9], 16  }
 0x18f   :  { %381 = vsyncadd [#allocation9], 4294967280 }
 0x190   :  { %259 = vsyncpa [#allocation3], 1 }
 0x191   :  { %260 = vsyncpa [#allocation6], 1 }
 0x192   :  { %261 = vsyncpa [#allocation4], 1 }
 0x193   :  { %262 = vsyncpa [#allocation9], 1 }

</bundles_post_ra>
